<compile_context>
chip_gen: v6e
topology: v6e:2x2x1
jax: 0.10.0
libtpu: 0.0.40
codegen_flags: <defaults>
</compile_context>

<pallas_src>
import jax
import jax.numpy as jnp
from jax import lax
from jax.experimental import pallas as pl
from jax.experimental.pallas import tpu as pltpu

EPS = 1e-5  # torch.nn.LayerNorm default

# Per-live-block byte target: tile-size sweeps put ~1-2 MiB blocks at ~85%+ of
# the HBM roofline (the ~0.35 us per-grid-step overhead is amortized); bigger
# blocks buy only a few percent more.
_TARGET_BLOCK_BYTES = 2 * 1024 * 1024

# Total live-footprint budget: 2 input + 2 output pipeline buffers plus the
# in-kernel f32 temporaries.  32 MiB keeps comfortable headroom even on v7x,
# whose physical VMEM is 64 MiB (v5e/v6e have 128 MiB physical but only
# 16/32 MiB *scoped default*, which we override below).
_VMEM_FOOTPRINT_BUDGET = 32 * 1024 * 1024

# Approximate in-kernel f32 temporaries per element (x in f32 + one more
# full-size f32 value live at the peak: x*x or the pre-cast output).
_F32_TEMP_BYTES_PER_ELEM = 8


def _layernorm_ncl_kernel(x_ref, g_ref, b_ref, o_ref):
    # x_ref: (H, tile_L) -- hidden on sublanes, seq on lanes (lane-dense).
    x = x_ref[...].astype(jnp.float32)
    H = x_ref.shape[0]
    inv_h = jnp.float32(1.0 / H)
    # One-pass statistics over the hidden (sublane) axis.
    s1 = jnp.sum(x, axis=0, keepdims=True)          # (1, tile_L)
    s2 = jnp.sum(x * x, axis=0, keepdims=True)      # (1, tile_L)
    mean = s1 * inv_h
    var = jnp.maximum(s2 * inv_h - mean * mean, 0.0)  # clamp tiny negative rounding
    inv = lax.rsqrt(var + EPS)                       # EUP slot, ~free
    g = g_ref[...].astype(jnp.float32)               # (H, 1)
    b = b_ref[...].astype(jnp.float32)               # (H, 1)
    o_ref[...] = ((x - mean) * inv * g + b).astype(o_ref.dtype)


def _choose_tile_l(B, H, L, itemsize):
    """Lane-tile (multiple of 128, or full L) sized by byte target + VMEM budget."""
    # Bytes per lane column, counting pipeline buffers AND in-kernel f32 temps.
    per_lane_live = H * (4 * itemsize + _F32_TEMP_BYTES_PER_ELEM)
    budget_lanes = _VMEM_FOOTPRINT_BUDGET // per_lane_live
    target_lanes = _TARGET_BLOCK_BYTES // (H * itemsize)
    # 128 is the hardware lane minimum; for pathologically large H this floor
    # is what bounds the footprint, not the budget (documented edge case).
    tile = max(128, (min(budget_lanes, target_lanes) // 128) * 128)

    if L <= tile:
        # Whole seq fits in one block.  Ensure the grid still has >=2 steps so
        # v7x's two TensorCores both get work when B == 1.
        if B == 1 and L >= 256:
            half = max(128, (pl.cdiv(L, 2 * 128)) * 128)
            if half < L:
                return half
        return L  # full seq axis: always a legal block dim
    return tile


def protein_resnet_layer_norm(x, gamma, beta):
    """x: (B, hidden, seq) -> (B, hidden, seq), matching the PyTorch module."""
    B, H, L = x.shape
    itemsize = x.dtype.itemsize
    tile_l = _choose_tile_l(B, H, L, itemsize)
    grid_l = pl.cdiv(L, tile_l)

    g2 = gamma.reshape(H, 1)
    b2 = beta.reshape(H, 1)

    # Explicit scoped-VMEM limit sized to the real footprint (+ headroom),
    # capped safely under v7x's 64 MiB physical VMEM.
    footprint = H * tile_l * (4 * itemsize + _F32_TEMP_BYTES_PER_ELEM) + 8 * H * 4
    vmem_limit = int(min(max(footprint + (4 << 20), 16 << 20), 48 << 20))

    return pl.pallas_call(
        _layernorm_ncl_kernel,
        out_shape=jax.ShapeDtypeStruct((B, H, L), x.dtype),
        grid_spec=pltpu.PrefetchScalarGridSpec(
            num_scalar_prefetch=0,
            grid=(B, grid_l),
            in_specs=[
                pl.BlockSpec((pl.Squeezed(), H, tile_l), lambda b, l: (b, 0, l)),
                pl.BlockSpec((H, 1), lambda b, l: (0, 0)),
                pl.BlockSpec((H, 1), lambda b, l: (0, 0)),
            ],
            out_specs=pl.BlockSpec((pl.Squeezed(), H, tile_l), lambda b, l: (b, 0, l)),
        ),
        compiler_params=pltpu.CompilerParams(
            dimension_semantics=("parallel", "parallel"),
            vmem_limit_bytes=vmem_limit,
        ),
    )(x, g2, b2)


if __name__ == "__main__":
    # Small shapes consistent with the module: batch=2, hidden=32, seq=8
    B, H, L = 2, 32, 8
    key = jax.random.PRNGKey(0)
    kx, kg, kb = jax.random.split(key, 3)
    x = jax.random.normal(kx, (B, H, L), dtype=jnp.float32)

    # Non-trivial affine parameters to exercise the gamma/beta broadcast path.
    gamma = 1.0 + 0.1 * jax.random.normal(kg, (H,), dtype=jnp.float32)
    beta = 0.1 * jax.random.normal(kb, (H,), dtype=jnp.float32)

    out = protein_resnet_layer_norm(x, gamma, beta)
    out = jax.block_until_ready(out)

    # Reference (plain JAX), identical math to torch.nn.LayerNorm on x.transpose(1,2)
    x_nlc = jnp.transpose(x, (0, 2, 1))
    mean = jnp.mean(x_nlc, axis=-1, keepdims=True)
    var = jnp.mean((x_nlc - mean) ** 2, axis=-1, keepdims=True)
    ref = (x_nlc - mean) * lax.rsqrt(var + EPS) * gamma + beta
    ref = jnp.transpose(ref, (0, 2, 1))
    assert out.shape == (B, H, L)
    assert jnp.max(jnp.abs(out - ref)) < 5e-5

    print("KERNEL_OK")
</pallas_src>

<mosaic_0001>
module attributes {stable_mosaic.version = 11 : i64} {
  func.func @_layernorm_ncl_kernel(%arg0: i32, %arg1: i32, %arg2: memref<1x32x8xf32, #tpu.memory_space<vmem>>, %arg3: memref<32x1xf32, #tpu.memory_space<vmem>>, %arg4: memref<32x1xf32, #tpu.memory_space<vmem>>, %arg5: memref<1x32x8xf32, #tpu.memory_space<vmem>>) attributes {dimension_semantics = [#tpu.dimension_semantics<parallel>, #tpu.dimension_semantics<parallel>], iteration_bounds = array<i64: 2, 1>, scalar_prefetch = 0 : i64, scratch_operands = 0 : i64, tpu.core_type = #tpu.core_type<tc>, window_params = [{transform_indices = @transform_0, window_bounds = array<i64: 1, 32, 8>}, {pipeline_mode = #tpu.pipeline_mode<synchronous>, transform_indices = @transform_1, window_bounds = array<i64: 32, 1>}, {pipeline_mode = #tpu.pipeline_mode<synchronous>, transform_indices = @transform_2, window_bounds = array<i64: 32, 1>}, {transform_indices = @transform_3, window_bounds = array<i64: 1, 32, 8>}]} {
    %c0 = arith.constant 0 : index
    %c0_0 = arith.constant 0 : index
    %c0_1 = arith.constant 0 : index
    %0 = vector.load %arg2[%c0, %c0_0, %c0_1] : memref<1x32x8xf32, #tpu.memory_space<vmem>>, vector<1x32x8xf32>
    %1 = vector.shape_cast %0 : vector<1x32x8xf32> to vector<32x8xf32>
    %cst = arith.constant dense<0.000000e+00> : vector<8xf32>
    %2 = vector.multi_reduction <add>, %1, %cst [0] : vector<32x8xf32> to vector<8xf32>
    %3 = vector.shape_cast %2 : vector<8xf32> to vector<1x8xf32>
    %4 = arith.mulf %1, %1 : vector<32x8xf32>
    %cst_2 = arith.constant dense<0.000000e+00> : vector<8xf32>
    %5 = vector.multi_reduction <add>, %4, %cst_2 [0] : vector<32x8xf32> to vector<8xf32>
    %6 = vector.shape_cast %5 : vector<8xf32> to vector<1x8xf32>
    %cst_3 = arith.constant 3.125000e-02 : f32
    %7 = vector.broadcast %cst_3 : f32 to vector<1x8xf32>
    %8 = arith.mulf %3, %7 : vector<1x8xf32>
    %cst_4 = arith.constant 3.125000e-02 : f32
    %9 = vector.broadcast %cst_4 : f32 to vector<1x8xf32>
    %10 = arith.mulf %6, %9 : vector<1x8xf32>
    %11 = arith.mulf %8, %8 : vector<1x8xf32>
    %12 = arith.subf %10, %11 : vector<1x8xf32>
    %cst_5 = arith.constant 0.000000e+00 : f32
    %13 = vector.broadcast %cst_5 : f32 to vector<1x8xf32>
    %14 = arith.maximumf %12, %13 : vector<1x8xf32>
    %cst_6 = arith.constant 9.99999974E-6 : f32
    %15 = vector.broadcast %cst_6 : f32 to vector<1x8xf32>
    %16 = arith.addf %14, %15 : vector<1x8xf32>
    %17 = math.rsqrt %16 : vector<1x8xf32>
    %c0_7 = arith.constant 0 : index
    %c0_8 = arith.constant 0 : index
    %18 = vector.load %arg3[%c0_7, %c0_8] : memref<32x1xf32, #tpu.memory_space<vmem>>, vector<32x1xf32>
    %c0_9 = arith.constant 0 : index
    %c0_10 = arith.constant 0 : index
    %19 = vector.load %arg4[%c0_9, %c0_10] : memref<32x1xf32, #tpu.memory_space<vmem>>, vector<32x1xf32>
    %20 = vector.broadcast %8 : vector<1x8xf32> to vector<32x8xf32>
    %21 = arith.subf %1, %20 : vector<32x8xf32>
    %22 = vector.broadcast %17 : vector<1x8xf32> to vector<32x8xf32>
    %23 = arith.mulf %21, %22 : vector<32x8xf32>
    %24 = vector.broadcast %18 : vector<32x1xf32> to vector<32x8xf32>
    %25 = arith.mulf %23, %24 : vector<32x8xf32>
    %26 = vector.broadcast %19 : vector<32x1xf32> to vector<32x8xf32>
    %27 = arith.addf %25, %26 : vector<32x8xf32>
    %c0_11 = arith.constant 0 : index
    %c0_12 = arith.constant 0 : index
    %c0_13 = arith.constant 0 : index
    %28 = vector.load %arg5[%c0_11, %c0_12, %c0_13] : memref<1x32x8xf32, #tpu.memory_space<vmem>>, vector<1x32x8xf32>
    %29 = vector.shape_cast %28 : vector<1x32x8xf32> to vector<32x8xf32>
    %30 = vector.shape_cast %27 : vector<32x8xf32> to vector<1x32x8xf32>
    tpu.vector_store %arg5[%c0_11, %c0_12, %c0_13], %30 {strides = array<i32>} : memref<1x32x8xf32, #tpu.memory_space<vmem>>, vector<1x32x8xf32>,
    return
  }
  func.func @transform_0(%arg0: i32, %arg1: i32) -> (i32, i32, i32) {
    %c0_i32 = arith.constant 0 : i32
    %c0_i32_0 = arith.constant 0 : i32
    return %arg0, %c0_i32, %arg1 : i32, i32, i32
  }
  func.func @transform_1(%arg0: i32, %arg1: i32) -> (i32, i32) {
    %c0_i32 = arith.constant 0 : i32
    %c0_i32_0 = arith.constant 0 : i32
    %c0_i32_1 = arith.constant 0 : i32
    return %c0_i32, %c0_i32_0 : i32, i32
  }
  func.func @transform_2(%arg0: i32, %arg1: i32) -> (i32, i32) {
    %c0_i32 = arith.constant 0 : i32
    %c0_i32_0 = arith.constant 0 : i32
    %c0_i32_1 = arith.constant 0 : i32
    return %c0_i32, %c0_i32_0 : i32, i32
  }
  func.func @transform_3(%arg0: i32, %arg1: i32) -> (i32, i32, i32) {
    %c0_i32 = arith.constant 0 : i32
    %c0_i32_0 = arith.constant 0 : i32
    return %arg0, %c0_i32, %arg1 : i32, i32, i32
  }
}

</mosaic_0001>

<bundles_post_ra>
// kernel: tpu_custom_call.1
= control target key start
LH: loop header
LB: loop body
LE: loop exit
PB: predicated region body
PF: predicated region fallthrough
CT: control target
= control target key end

     0   :  { %s482_s12 = smov 0   ;;  %s484_s13 = smov 0   ;;  %s562_s0 = inlined_call_operand.vmem [shape: f32[2,32,8], index: 0, kind: input, shape index: {}]   ;;  %s563_s1 = inlined_call_operand.vmem [shape: f32[32,1], index: 1, kind: input, shape index: {}]   ;;  %s564_s2 = inlined_call_operand.vmem [shape: f32[32,1], index: 2, kind: input, shape index: {}]   ;;  %s565_s3 = inlined_call_operand.vmem [shape: f32[2,32,8], index: 3, kind: output, shape index: {}]  }
   0x1   :  { %s486_s14 = smov 0  }
   0x2 LB: > { %s25_s15 = sadd.s32 1, %s455_s13  ;;  %p399_p0 = scmp.ge.s32.totalorder %s459_s14, 1  ;;  %s459_s14 = sphi %s486_s14, %s13_s14   ;;  %s455_s13 = sphi %s484_s13, %s567_s13   ;;  %s451_s12 = sphi %s482_s12, %s566_s12  }
   0x3   : > { %p27_p1 = scmp.ge.s32.totalorder %s25_s15, 2  ;;  %p156_p2 = scmp.lt.s32.totalorder %s459_s14, 3 }
   0x5   : > { %s569_s15 = smov (%p27_p1, %s25_s15), 0  ;;  %p157_p3 = pnand %p399_p0, %p156_p2 }
   0x6   : > { %p186_p4 = scmp.lt.s32.totalorder (!%p157_p3), %s451_s12, 1 }
   0x7   : > { %160 = sbr.rel (%p157_p3) target bundleno = 153 (0x99), region = 32 }
   0xc   : > { %v246_v0 = vld [vmem:[%s563_s1 + $0x10] sm:$0xff]  ;;  %v244_v1 = vld [vmem:[%s563_s1] sm:$0xff]  ;;  %v461_v2 = vmov 0   ;;  %v247_v3 = vld [vmem:[%s563_s1 + $0x18] sm:$0xff]  ;;  %s571_s12 = smov (!%p186_p4, %s451_s12), 1  ;;  %vm206_vm0 = vcmask 64512  }
   0xd   : > { %434 = vset.pattern.permute.xlu1 %v461_v2  ;;  %433 = vset.pattern.permute.xlu0 %v461_v2  ;;  %v245_v4 = vld [vmem:[%s563_s1 + $0x8] sm:$0xff]  ;;  %v248_v6 = vld [vmem:[%s564_s2] sm:$0xff]  ;;  %v251_v7 = vld [vmem:[%s564_s2 + $0x18] sm:$0xff]  ;;  %s406_s5 = sshll.u32 %s571_s12, 5 }
   0xe   : > { %272 = vperm.xlu1 %434, %v246_v0   ;;  %262 = vperm.xlu0 %433, %v244_v1   ;;  %v249_v5 = vld [vmem:[%s564_s2 + $0x8] sm:$0xff]  ;;  %v250_v8 = vld [vmem:[%s564_s2 + $0x10] sm:$0xff]  ;;  %s193_s8 = scalar_lea.vmem %s562_s0, %s406_s5  ;;  %s201_s11 = scalar_lea.vmem %s565_s3, %s406_s5 }
   0xf   : > { %v202_v9 = vld [vmem:[%s193_s8] sm:$0xff]  ;;  %v203_v10 = vld [vmem:[%s193_s8 + $0x8] sm:$0xff]  ;;  %v204_v15 = vld [vmem:[%s193_s8 + $0x10] sm:$0xff] }
  0x10   : > { %v207_v11 = vsel %vm206_vm0, %v202_v9, 0.0  ;;  %v208_v12 = vsel %vm206_vm0, %v203_v10, 0.0  ;;  %v220_v13 = vmul.f32 %v202_v9, %v202_v9  ;;  %v221_v14 = vmul.f32 %v203_v10, %v203_v10  ;;  %v205_v21 = vld [vmem:[%s193_s8 + $0x18] sm:$0xff] }
  0x11   : > { %v209_v16 = vadd.f32 %v208_v12, %v207_v11  ;;  %v210_v17 = vsel %vm206_vm0, %v204_v15, 0.0  ;;  %v222_v18 = vmul.f32 %v204_v15, %v204_v15  ;;  %v212_v24 = vsel %vm206_vm0, %v205_v21, 0.0 }
  0x12   : > { %277 = vperm.xlu1 %434, %v247_v3   ;;  %267 = vperm.xlu0 %433, %v245_v4   ;;  %v224_v19 = vsel %vm206_vm0, %v220_v13, 0.0  ;;  %v225_v20 = vsel %vm206_vm0, %v221_v14, 0.0  ;;  %v223_v25 = vmul.f32 %v205_v21, %v205_v21 }
  0x13   : > { %v211_v22 = vadd.f32 %v210_v17, %v209_v16  ;;  %v226_v23 = vadd.f32 %v225_v20, %v224_v19  ;;  %v227_v26 = vsel %vm206_vm0, %v222_v18, 0.0 }
  0x14   : > { %v229_v29 = vsel %vm206_vm0, %v223_v25, 0.0 }
  0x15   : > { %v213_v27 = vadd.f32 %v212_v24, %v211_v22  ;;  %v228_v28 = vadd.f32 %v227_v26, %v226_v23 }
  0x16   : > { %291 = vperm.xlu1 %434, %v249_v5   ;;  %286 = vperm.xlu0 %433, %v248_v6  }
  0x17   : > { %v214_v30 = vrot.slane %v213_v27, 4  ;;  %v230_v31 = vadd.f32 %v229_v29, %v228_v28 }
  0x19   : > { %v215_v32 = vadd.f32 %v214_v30, %v213_v27  ;;  %v231_v33 = vrot.slane %v230_v31, 4 }
  0x1a   : > { %301 = vperm.xlu1 %434, %v251_v7   ;;  %296 = vperm.xlu0 %433, %v250_v8  }
  0x1b   : > { %v216_v34 = vrot.slane %v215_v32, 2  ;;  %v232_v35 = vadd.f32 %v231_v33, %v230_v31 }
  0x1d   : > { %v217_v36 = vadd.f32 %v216_v34, %v215_v32  ;;  %v233_v37 = vrot.slane %v232_v35, 2 }
  0x1f   : > { %v218_v38 = vrot.slane %v217_v36, 1  ;;  %v234_v39 = vadd.f32 %v233_v37, %v232_v35 }
  0x21   : > { %v219_v40 = vadd.f32 %v218_v38, %v217_v36  ;;  %v235_v41 = vrot.slane %v234_v39, 1 }
  0x23   : > { %v236_v42 = vadd.f32 %v235_v41, %v234_v39  ;;  %v237_v43 = vmul.f32 0.03125, %v219_v40 }
  0x25   : > { %v238_v44 = vmul.f32 0.03125, %v236_v42  ;;  %v239_v45 = vmul.f32 %v237_v43, %v237_v43  ;;  %v252_v49 = vsub.f32 %v202_v9, %v237_v43  ;;  %v253_v50 = vsub.f32 %v203_v10, %v237_v43 }
  0x26   : > { %v254_v54 = vsub.f32 %v204_v15, %v237_v43  ;;  %v255_v56 = vsub.f32 %v205_v21, %v237_v43 }
  0x27   : > { %v240_v46 = vsub.f32 %v238_v44, %v239_v45 }
  0x29   : > { %v241_v47 = vmax.f32 %v240_v46, 0.0 }
  0x2b   : > { %v242_v48 = vadd.f32 1e-05, %v241_v47 }
  0x2d   : > { %435 = vrsqrt.f32 %v242_v48 }
  0x3a   : > { %v436_v51 = vpop.eup %435 }
  0x3b   : > { %v256_v55 = vmul.f32 %v436_v51, %v252_v49  ;;  %v257_v57 = vmul.f32 %v436_v51, %v253_v50  ;;  %v258_v60 = vmul.f32 %v436_v51, %v254_v54  ;;  %v259_v62 = vmul.f32 %v436_v51, %v255_v56 }
  0x89   : > { %v273_v52 = vpop.permute.xlu1 %272  ;;  %v263_v53 = vpop.permute.xlu0 %262 }
  0x8a   : > { %v280_v61 = vmul.f32 %v263_v53, %v256_v55  ;;  %v282_v4 = vmul.f32 %v273_v52, %v258_v60 }
  0x8d   : > { %v278_v58 = vpop.permute.xlu1 %277  ;;  %v268_v59 = vpop.permute.xlu0 %267 }
  0x8e   : > { %v281_v63 = vmul.f32 %v268_v59, %v257_v57  ;;  %v283_v5 = vmul.f32 %v278_v58, %v259_v62 }
  0x91   : > { %v292_v0 = vpop.permute.xlu1 %291  ;;  %v287_v1 = vpop.permute.xlu0 %286 }
  0x92   : > { %v305_v2 = vadd.f32 %v292_v0, %v281_v63  ;;  %v304_v3 = vadd.f32 %v287_v1, %v280_v61 }
  0x94   : > { %309 = vst.msk [vmem:[%s201_s11 + $0x8] sm:$0xff] %vm206_vm0, %v305_v2  ;;  %308 = vst.msk [vmem:[%s201_s11] sm:$0xff] %vm206_vm0, %v304_v3 }
  0x95   : > { %v302_v6 = vpop.permute.xlu1 %301  ;;  %v297_v7 = vpop.permute.xlu0 %296 }
  0x96   : > { %v307_v8 = vadd.f32 %v302_v6, %v283_v5  ;;  %v306_v9 = vadd.f32 %v297_v7, %v282_v4 }
  0x98   : > { %311 = vst.msk [vmem:[%s201_s11 + $0x18] sm:$0xff] %vm206_vm0, %v307_v8  ;;  %310 = vst.msk [vmem:[%s201_s11 + $0x10] sm:$0xff] %vm206_vm0, %v306_v9 }
  0x99 PF: > { %s13_s14 = sadd.s32 1, %s459_s14   ;;  %s566_s12 = smov %s455_s13 }
  0x9a   : > { %p10_p5 = scmp.ge.s32.totalorder %s13_s14, 4   ;;  %s567_s13 = smov %s569_s15 }
  0x9c   :  { %12 = sbr.rel (!%p10_p5) target bundleno = 2 (0x2), region = 62 }

</bundles_post_ra>
